<compile_context>
chip_gen: v6e
topology: v6e:2x2x1
jax: 0.10.0
libtpu: 0.0.40
codegen_flags: <defaults>
</compile_context>

<pallas_src>
import math
import functools

import jax
import jax.numpy as jnp
from jax.experimental import pallas as pl
from jax.experimental.pallas import tpu as pltpu


def make_positional_encoding(max_len: int, d_model: int) -> jnp.ndarray:
    """Deterministic buffer identical to the torch __init__ computation.
    Returns pe of shape (max_len, 1, d_model), float32. Handles odd d_model."""
    position = jnp.arange(0, max_len, dtype=jnp.float32)[:, None]             # (max_len, 1)
    div_term = jnp.exp(
        jnp.arange(0, d_model, 2, dtype=jnp.float32) * (-math.log(10000.0) / d_model)
    )                                                                          # (ceil(d/2),)
    pe = jnp.zeros((max_len, d_model), dtype=jnp.float32)
    pe = pe.at[:, 0::2].set(jnp.sin(position * div_term))
    pe = pe.at[:, 1::2].set(jnp.cos(position * div_term)[:, : d_model // 2])
    return pe[:, None, :]                                                      # (max_len, 1, d_model)


# ---------------------------------------------------------------------------
# Kernels
# ---------------------------------------------------------------------------

def _pe_add_kernel(x_ref, pe_ref, o_ref):
    # x: (TS, B, D), pe: (TS, 1, D) -> sublane broadcast in vregs, no HBM dup.
    o_ref[...] = x_ref[...] + pe_ref[...]


def _pe_add_kernel_flat(x_ref, pe_ref, o_ref, *, batch: int):
    # x: (TS, B*D), pe: (TS, D) -> in-VMEM lane tile across batch.
    o_ref[...] = x_ref[...] + jnp.tile(pe_ref[...], (1, batch))


def _pe_add_dropout_kernel(x_ref, pe_ref, u_ref, o_ref, *, p: float, scale: float):
    y = x_ref[...] + pe_ref[...]
    keep = u_ref[...] >= jnp.float32(p)            # keep prob = 1 - p
    o_ref[...] = jnp.where(keep, y * scale, 0.0)   # fused mask + inverted-dropout scale


def _pe_add_dropout_kernel_flat(x_ref, pe_ref, u_ref, o_ref, *, batch: int, p: float, scale: float):
    y = x_ref[...] + jnp.tile(pe_ref[...], (1, batch))
    keep = u_ref[...] >= jnp.float32(p)
    o_ref[...] = jnp.where(keep, y * scale, 0.0)


# ---------------------------------------------------------------------------
# Tiling helpers
# ---------------------------------------------------------------------------

def _sublane_multiple(itemsize: int) -> int:
    # 8 rows/vreg for 4-byte, 16 for 2-byte, 32 for 1-byte dtypes.
    return 8 * max(1, 4 // max(1, itemsize))


def _num_tensorcores() -> int:
    try:
        d = jax.devices()[0]
        if d.platform != "tpu":
            return 1
        kind = (getattr(d, "device_kind", "") or "").lower()
        return 2 if "v7" in kind else 1            # v7x: 2 TCs/chip; v5e/v6e: 1
    except Exception:  # pragma: no cover
        return 1


def _choose_ts(S: int, row_total_bytes: int, sub: int, n_cores: int,
               target_bytes: int = 12 << 20) -> int:
    """Rows per grid step. Largest block within the per-step byte budget,
    rounded to the sublane multiple; on multi-TC chips make the step count a
    multiple of n_cores for an even split."""
    ts = max(sub, (target_bytes // max(1, row_total_bytes)) // sub * sub)
    if ts >= S:
        return S                                   # single full block
    steps = -(-S // ts)
    if n_cores > 1 and steps > 1:
        steps = -(-steps // n_cores) * n_cores     # even split across TCs
        ts = -(-S // steps)
        ts = -(-ts // sub) * sub
    return min(max(ts, sub), S)


# ---------------------------------------------------------------------------
# Wrapper
# ---------------------------------------------------------------------------

def positional_encoding_forward(x, pe, *, p: float = 0.1, training: bool = False,
                                rng_key=None):
    """x: (S, B, D); pe: (max_len, 1, D). Returns dropout(x + pe[:S])."""
    S, B, D = x.shape
    if S > pe.shape[0]:
        raise ValueError(f"sequence length {S} exceeds max_len {pe.shape[0]}")

    # Degenerate dropout: p >= 1 zeroes everything.
    if training and p >= 1.0:
        return jnp.zeros_like(x)
    apply_dropout = training and p > 0.0

    itemsize = jnp.dtype(x.dtype).itemsize
    sub = _sublane_multiple(itemsize)
    n_cores = _num_tensorcores()

    # pe cast once; stays (S, 1, D) in HBM — no batch duplication.
    pe_s = pe[:S].astype(x.dtype)

    # Lane-dense flattened view only when it actually helps.
    use_flat = (D % 128 != 0) and ((B * D) % 128 == 0) and B > 1

    # Bytes per sequence row of everything that is pipelined (x + out + pe [+ mask]).
    row_x = B * D * itemsize
    row_pe = D * itemsize
    row_u = B * D * 4 if apply_dropout else 0
    row_total = 2 * row_x + row_pe + row_u

    TS = _choose_ts(S, row_total, sub, n_cores)
    grid = (pl.cdiv(S, TS),)

    vmem_limit = int(min(48 << 20, max(32 << 20, 2 * TS * row_total + (4 << 20))))
    cparams = pltpu.CompilerParams(
        dimension_semantics=("parallel",),
        vmem_limit_bytes=vmem_limit,
    )

    scale = 1.0
    u = None
    if apply_dropout:
        if rng_key is None:
            rng_key = jax.random.PRNGKey(0)
        # Host-side uniform mask source; kernel fuses compare+select+scale.
        u = jax.random.uniform(rng_key, (S, B, D), dtype=jnp.float32)
        scale = 1.0 / (1.0 - p)

    if use_flat:
        BD = B * D
        x_in = x.reshape(S, BD)
        pe_in = pe_s[:, 0, :]                                     # (S, D)
        x_spec = pl.BlockSpec((TS, BD), lambda i: (i, 0))
        pe_spec = pl.BlockSpec((TS, D), lambda i: (i, 0))
        out_shape = jax.ShapeDtypeStruct((S, BD), x.dtype)
        if apply_dropout:
            kernel = functools.partial(_pe_add_dropout_kernel_flat,
                                       batch=B, p=float(p), scale=float(scale))
            in_specs = [x_spec, pe_spec, pl.BlockSpec((TS, BD), lambda i: (i, 0))]
            args = (x_in, pe_in, u.reshape(S, BD))
        else:
            kernel = functools.partial(_pe_add_kernel_flat, batch=B)
            in_specs = [x_spec, pe_spec]
            args = (x_in, pe_in)
        out = pl.pallas_call(
            kernel,
            out_shape=out_shape,
            grid_spec=pl.GridSpec(grid=grid, in_specs=in_specs, out_specs=x_spec),
            compiler_params=cparams,
        )(*args)
        return out.reshape(S, B, D)

    # 3-D path: blocks' last two dims equal the full (B, D) dims -> always legal.
    x_spec = pl.BlockSpec((TS, B, D), lambda i: (i, 0, 0))
    pe_spec = pl.BlockSpec((TS, 1, D), lambda i: (i, 0, 0))
    out_shape = jax.ShapeDtypeStruct((S, B, D), x.dtype)
    if apply_dropout:
        kernel = functools.partial(_pe_add_dropout_kernel, p=float(p), scale=float(scale))
        in_specs = [x_spec, pe_spec, pl.BlockSpec((TS, B, D), lambda i: (i, 0, 0))]
        args = (x, pe_s, u)
    else:
        kernel = _pe_add_kernel
        in_specs = [x_spec, pe_spec]
        args = (x, pe_s)
    return pl.pallas_call(
        kernel,
        out_shape=out_shape,
        grid_spec=pl.GridSpec(grid=grid, in_specs=in_specs, out_specs=x_spec),
        compiler_params=cparams,
    )(*args)


if __name__ == "__main__":
    # Shapes consistent with the module: seq=8, batch=2, d_model=32.
    S, B, D = 8, 2, 32
    MAX_LEN = 64
    p_drop = 0.1

    key = jax.random.PRNGKey(0)
    kx, kd, kx2, kd2 = jax.random.split(key, 4)

    # ---- 3-D path (D not a multiple of 128) --------------------------------
    x = jax.random.normal(kx, (S, B, D), dtype=jnp.float32)
    pe = make_positional_encoding(MAX_LEN, D)
    ref = x + pe[:S]

    out = jax.block_until_ready(positional_encoding_forward(x, pe, p=p_drop, training=False))
    assert out.shape == (S, B, D)
    assert jnp.allclose(out, ref, atol=1e-6, rtol=1e-6), "mismatch vs reference (eval, 3-D)"

    out_tr = jax.block_until_ready(
        positional_encoding_forward(x, pe, p=p_drop, training=True, rng_key=kd))
    mask = jax.random.uniform(kd, (S, B, D), dtype=jnp.float32) >= p_drop
    ref_tr = jnp.where(mask, ref * (1.0 / (1.0 - p_drop)), 0.0)
    assert jnp.allclose(out_tr, ref_tr, atol=1e-5, rtol=1e-5), "mismatch (training, 3-D)"

    # ---- flattened lane-dense path (D < 128, B*D multiple of 128) ----------
    D2 = 64
    x2 = jax.random.normal(kx2, (S, B, D2), dtype=jnp.float32)
    pe2 = make_positional_encoding(MAX_LEN, D2)
    ref2 = x2 + pe2[:S]

    out2 = jax.block_until_ready(positional_encoding_forward(x2, pe2, p=p_drop, training=False))
    assert jnp.allclose(out2, ref2, atol=1e-6, rtol=1e-6), "mismatch vs reference (eval, flat)"

    out2_tr = jax.block_until_ready(
        positional_encoding_forward(x2, pe2, p=p_drop, training=True, rng_key=kd2))
    mask2 = jax.random.uniform(kd2, (S, B, D2), dtype=jnp.float32) >= p_drop
    ref2_tr = jnp.where(mask2, ref2 * (1.0 / (1.0 - p_drop)), 0.0)
    assert jnp.allclose(out2_tr, ref2_tr, atol=1e-5, rtol=1e-5), "mismatch (training, flat)"

    print("KERNEL_OK")
</pallas_src>

<mosaic_0001>
module attributes {stable_mosaic.version = 11 : i64} {
  func.func @_pe_add_kernel(%arg0: i32, %arg1: memref<8x2x32xf32, #tpu.memory_space<vmem>>, %arg2: memref<8x1x32xf32, #tpu.memory_space<vmem>>, %arg3: memref<8x2x32xf32, #tpu.memory_space<vmem>>) attributes {dimension_semantics = [#tpu.dimension_semantics<parallel>], iteration_bounds = array<i64: 1>, scalar_prefetch = 0 : i64, scratch_operands = 0 : i64, tpu.core_type = #tpu.core_type<tc>, window_params = [{transform_indices = @transform_0, window_bounds = array<i64: 8, 2, 32>}, {transform_indices = @transform_1, window_bounds = array<i64: 8, 1, 32>}, {transform_indices = @transform_2, window_bounds = array<i64: 8, 2, 32>}]} {
    %c0 = arith.constant 0 : index
    %c0_0 = arith.constant 0 : index
    %c0_1 = arith.constant 0 : index
    %0 = vector.load %arg1[%c0, %c0_0, %c0_1] : memref<8x2x32xf32, #tpu.memory_space<vmem>>, vector<8x2x32xf32>
    %c0_2 = arith.constant 0 : index
    %c0_3 = arith.constant 0 : index
    %c0_4 = arith.constant 0 : index
    %1 = vector.load %arg2[%c0_2, %c0_3, %c0_4] : memref<8x1x32xf32, #tpu.memory_space<vmem>>, vector<8x1x32xf32>
    %2 = vector.broadcast %1 : vector<8x1x32xf32> to vector<8x2x32xf32>
    %3 = arith.addf %0, %2 : vector<8x2x32xf32>
    %c0_5 = arith.constant 0 : index
    %c0_6 = arith.constant 0 : index
    %c0_7 = arith.constant 0 : index
    %4 = vector.load %arg3[%c0_5, %c0_6, %c0_7] : memref<8x2x32xf32, #tpu.memory_space<vmem>>, vector<8x2x32xf32>
    tpu.vector_store %arg3[%c0_5, %c0_6, %c0_7], %3 {strides = array<i32>} : memref<8x2x32xf32, #tpu.memory_space<vmem>>, vector<8x2x32xf32>,
    return
  }
  func.func @transform_0(%arg0: i32) -> (i32, i32, i32) {
    %c0_i32 = arith.constant 0 : i32
    %c0_i32_0 = arith.constant 0 : i32
    %c0_i32_1 = arith.constant 0 : i32
    return %arg0, %c0_i32, %c0_i32_0 : i32, i32, i32
  }
  func.func @transform_1(%arg0: i32) -> (i32, i32, i32) {
    %c0_i32 = arith.constant 0 : i32
    %c0_i32_0 = arith.constant 0 : i32
    %c0_i32_1 = arith.constant 0 : i32
    return %arg0, %c0_i32, %c0_i32_0 : i32, i32, i32
  }
  func.func @transform_2(%arg0: i32) -> (i32, i32, i32) {
    %c0_i32 = arith.constant 0 : i32
    %c0_i32_0 = arith.constant 0 : i32
    %c0_i32_1 = arith.constant 0 : i32
    return %arg0, %c0_i32, %c0_i32_0 : i32, i32, i32
  }
}

</mosaic_0001>

<bundles_post_ra>
// kernel: tpu_custom_call.1
= control target key start
LH: loop header
LB: loop body
LE: loop exit
PB: predicated region body
PF: predicated region fallthrough
CT: control target
= control target key end

     0   :  { %7 = vsyncpa [#allocation3], 0  ;;  %s268_s0 = inlined_call_operand.hbm [shape: f32[8,2,32], index: 0, kind: input, shape index: {}]   ;;  %s269_s1 = inlined_call_operand.hbm [shape: f32[8,1,32], index: 1, kind: input, shape index: {}]   ;;  %s270_s2 = inlined_call_operand.hbm [shape: f32[8,2,32], index: 2, kind: output, shape index: {}]  }
   0x1   :  { %8 = vsyncpa [#allocation6], 0 }
   0x2   :  { %9 = vsyncpa [#allocation4], 0  ;;  %s220_s9 = smov [#allocation2]  }
   0x3   :  { %s15_s10 = sshll.u32 %s220_s9, 4  ;;  %s16_s10 = int_to_ptr.vmem [resolvable:$true] %s15_s10 }
   0x4   :  { %s162_s11 = scalar_lea.vmem %s16_s10, 256  ;;  %p167_p1 = scmp.lt.s32.totalorder %s16_s10, %s16_s10 }
   0x5   :  { %p163_p0 = scmp.ne.s32.totalorder %s16_s10, %s162_s11  ;;  %p168_p2 = scmp.lt.s32.totalorder %s162_s11, %s162_s11 }
   0x7   :  { %p169_p3 = por %p168_p2, %p167_p1 }
   0x9   :  { %p170_p4 = pnand %p169_p3, %p163_p0 }
   0xb   :  { %173 = shalt.err (!%p170_p4)
}
   0xc   :  { %s221_s12 = smov 32   ;;  %s222_s13 = smov 2  }
   0xd   :  { %21 = dma.hbm_to_vmem [thread:$0]  %s268_s0, 256, %s16_s10, [#allocation3], %s221_s12, %s221_s12, %s222_s13  }
   0xe   :  { %s223_s16 = smov [#allocation5]  }
   0xf   :  { %s27_s17 = sshll.u32 %s223_s16, 4  ;;  %s28_s17 = int_to_ptr.vmem [resolvable:$true] %s27_s17 }
  0x10   :  { %s182_s18 = scalar_lea.vmem %s28_s17, 128  ;;  %p187_p6 = scmp.lt.s32.totalorder %s28_s17, %s28_s17 }
  0x11   :  { %p183_p5 = scmp.ne.s32.totalorder %s28_s17, %s182_s18  ;;  %p188_p7 = scmp.lt.s32.totalorder %s182_s18, %s182_s18 }
  0x13   :  { %p189_p8 = por %p188_p7, %p187_p6 }
  0x15   :  { %p190_p9 = pnand %p189_p8, %p183_p5 }
  0x17   :  { %193 = shalt.err (!%p190_p9)
}
  0x18   :  { %s224_s19 = smov 16   ;;  %s225_s20 = smov 1  }
  0x19   :  { %33 = dma.hbm_to_vmem [thread:$0]  %s269_s1, 128, %s28_s17, [#allocation6], %s224_s19, %s224_s19, %s225_s20  }
  0x1a   :  { %214 = dma.done.wait [#allocation3], 256  }
  0x1b   :  { %215 = vsyncadd [#allocation3], 4294967040 }
  0x1c   :  { %216 = dma.done.wait [#allocation6], 128  }
  0x1d   :  { %217 = vsyncadd [#allocation6], 4294967168  ;;  %vm112_vm0 = vcmask 254976   ;;  %s226_s0 = smov [#allocation7]   ;;  %v40_v0 = vld [vmem:[#allocation2] sm:$0x3] }
  0x1e   :  { %s251_s23 = sshll.u32 %s226_s0, 4  ;;  %v139_v1 = vld [vmem:[#allocation5] ss:$0 sm:$0xff]  ;;  %v41_v2 = vld [vmem:[#allocation2 + $0x2] sm:$0x3]  ;;  %s127_s23 = int_to_ptr.vmem [resolvable:$true] %s251_s23 }
  0x1f   :  { %v104_v3 = vadd.f32 %v139_v1, %v40_v0  ;;  %v140_v4 = vld [vmem:[#allocation5 + $0x1] ss:$0 sm:$0xff]  ;;  %v42_v5 = vld [vmem:[#allocation2 + $0x4] sm:$0x3]  ;;  %v141_v6 = vld [vmem:[#allocation5 + $0x2] ss:$0 sm:$0xff]  ;;  %p199_p11 = scmp.lt.s32.totalorder %s127_s23, %s127_s23 }
  0x20   :  { %v105_v7 = vadd.f32 %v140_v4, %v41_v2  ;;  %v106_v8 = vadd.f32 %v141_v6, %v42_v5  ;;  %v43_v9 = vld [vmem:[#allocation2 + $0x6] sm:$0x3]  ;;  %v142_v10 = vld [vmem:[#allocation5 + $0x3] ss:$0 sm:$0xff]  ;;  %v44_v11 = vld [vmem:[#allocation2 + $0x8] sm:$0x3] }
  0x21   :  { %113 = vst.msk [vmem:[#allocation7] sm:$0x3] %vm112_vm0, %v104_v3  ;;  %v107_v12 = vadd.f32 %v142_v10, %v43_v9  ;;  %v143_v13 = vld [vmem:[#allocation5 + $0x4] ss:$0 sm:$0xff]  ;;  %v45_v14 = vld [vmem:[#allocation2 + $0xa] sm:$0x3] }
  0x22   :  { %v144_v15 = vld [vmem:[#allocation5 + $0x5] ss:$0 sm:$0xff]  ;;  %114 = vst.msk [vmem:[#allocation7 + $0x2] sm:$0x3] %vm112_vm0, %v105_v7  ;;  %115 = vst.msk [vmem:[#allocation7 + $0x4] sm:$0x3] %vm112_vm0, %v106_v8  ;;  %v108_v16 = vadd.f32 %v143_v13, %v44_v11 }
  0x23   :  { %v109_v17 = vadd.f32 %v144_v15, %v45_v14  ;;  %v46_v18 = vld [vmem:[#allocation2 + $0xc] sm:$0x3]  ;;  %v145_v19 = vld [vmem:[#allocation5 + $0x6] ss:$0 sm:$0xff]  ;;  %v47_v20 = vld [vmem:[#allocation2 + $0xe] sm:$0x3] }
  0x24   :  { %116 = vst.msk [vmem:[#allocation7 + $0x6] sm:$0x3] %vm112_vm0, %v107_v12  ;;  %v110_v21 = vadd.f32 %v145_v19, %v46_v18  ;;  %v146_v22 = vld [vmem:[#allocation5 + $0x7] ss:$0 sm:$0xff]  ;;  %117 = vst.msk [vmem:[#allocation7 + $0x8] sm:$0x3] %vm112_vm0, %v108_v16 }
  0x25   :  { %118 = vst.msk [vmem:[#allocation7 + $0xa] sm:$0x3] %vm112_vm0, %v109_v17  ;;  %v111_v23 = vadd.f32 %v146_v22, %v47_v20  ;;  %s194_s1 = scalar_lea.vmem %s127_s23, 256 }
  0x26   :  { %119 = vst.msk [vmem:[#allocation7 + $0xc] sm:$0x3] %vm112_vm0, %v110_v21  ;;  %p195_p10 = scmp.ne.s32.totalorder %s127_s23, %s194_s1  ;;  %p200_p12 = scmp.lt.s32.totalorder %s194_s1, %s194_s1 }
  0x27   :  { %120 = vst.msk [vmem:[#allocation7 + $0xe] sm:$0x3] %vm112_vm0, %v111_v23 }
  0x28   :  { %p201_p13 = por %p200_p12, %p199_p11 }
  0x2a   :  { %p202_p0 = pnand %p201_p13, %p195_p10 }
  0x2c   :  { %205 = shalt.err (!%p202_p0)
}
  0x2d   :  { %132 = dma.vmem_to_hbm [thread:$0]  %s127_s23, 256, %s270_s2, [#allocation4], %s221_s12, %s221_s12, %s222_s13  }
  0x2e   :  { %218 = dma.done.wait [#allocation4], 256  }
  0x2f   :  { %219 = vsyncadd [#allocation4], 4294967040 }
  0x30   :  { %136 = vsyncpa [#allocation3], 1 }
  0x31   :  { %137 = vsyncpa [#allocation6], 1 }
  0x32   :  { %138 = vsyncpa [#allocation4], 1 }

</bundles_post_ra>
